<compile_context>
chip_gen: v7x
topology: tpu7x:2x2x1
jax: 0.10.0
libtpu: 0.0.40
codegen_flags: <defaults>
</compile_context>

<pallas_src>
import jax
import jax.numpy as jnp
from jax.experimental import pallas as pl
from jax.experimental.pallas import tpu as pltpu

LANES = 128


def _round_up(x: int, m: int) -> int:
    return ((x + m - 1) // m) * m


def _device_kind() -> str:
    try:
        return jax.devices()[0].device_kind.lower()
    except Exception:
        return ""


def _num_tensorcores() -> int:
    # Only v7x has 2 TensorCores per chip; v5e/v6e are single-core, where the
    # leading "parallel" axis would just be a sequential loop with extra
    # duplicated-tile reads and init/finalize overhead.
    kind = _device_kind()
    return 2 if ("v7" in kind or "tpu7" in kind) else 1


def _pick_tiling() -> tuple[int, int]:
    # (max_tile_rows, vmem_limit_bytes)
    kind = _device_kind()
    if "v7" in kind or "tpu7" in kind:
        # 8 MiB f32 blocks -> 32 MiB double-buffered inputs; well under the
        # 48 MiB scoped limit and v7x's 64 MiB physical VMEM.
        return 16384, 48 << 20
    # 4 MiB f32 blocks -> 16 MiB double-buffered inputs. vmem_limit_bytes is
    # raised because v5e's DEFAULT scoped VMEM is only 16 MiB (physical 128).
    return 8192, 48 << 20


def _make_mse_kernel(rows: int, tile_rows: int, tiles_per_core: int):
    assert tile_rows % 8 == 0
    groups = tile_rows // 8

    def kernel(x_ref, y_ref, out_ref):
        c = pl.program_id(0)  # core / parallel axis
        r = pl.program_id(1)  # row-tile (reduction) axis

        @pl.when(r == 0)
        def _():
            out_ref[...] = jnp.zeros_like(out_ref)

        diff = x_ref[...].astype(jnp.float32) - y_ref[...].astype(jnp.float32)
        sq = diff * diff

        # Row-granular (not element-granular) index math: small int32 values.
        tile_start_row = (c * tiles_per_core + r) * tile_rows
        is_interior = (tile_start_row + tile_rows) <= rows

        @pl.when(is_interior)
        def _():
            # Hot path: pure VPU fold of 8-row groups into the (8,128)
            # accumulator block — no iota / compare / select.
            out_ref[...] += sq.reshape(groups, 8, LANES).sum(axis=0)

        @pl.when(jnp.logical_not(is_interior))
        def _():
            # Boundary tile (ragged rows) or fully-duplicated clamped tile:
            # mask out rows >= rows. Runs at most once per core.
            row_id = (
                jax.lax.broadcasted_iota(jnp.int32, (tile_rows, LANES), 0)
                + tile_start_row
            )
            masked = jnp.where(row_id < rows, sq, 0.0)
            out_ref[...] += masked.reshape(groups, 8, LANES).sum(axis=0)

    return kernel


def mse_loss(inputs: jax.Array, target: jax.Array) -> jax.Array:
    assert inputs.shape == target.shape, "inputs/target shapes must match"
    n_elems = inputs.size
    if n_elems == 0:
        # Matches torch.nn.functional.mse_loss on empty tensors (NaN).
        return jnp.array(jnp.nan, dtype=jnp.float32)

    x = inputs.reshape(-1)
    y = target.reshape(-1)

    inv_n = jnp.float32(1.0 / n_elems)
    n_main = (n_elems // LANES) * LANES

    # <128-element ragged lane tail: tiny plain-JAX expression instead of a
    # full-array jnp.pad copy (which would roughly double HBM traffic).
    tail_sum = None
    if n_main < n_elems:
        tx = x[n_main:].astype(jnp.float32)
        ty = y[n_main:].astype(jnp.float32)
        tail_sum = jnp.sum((tx - ty) ** 2)

    if n_main == 0:
        return tail_sum * inv_n

    rows = n_main // LANES
    x2d = x[:n_main].reshape(rows, LANES)   # zero-copy reshape, native dtype
    y2d = y[:n_main].reshape(rows, LANES)

    max_tile_rows, vmem_limit = _pick_tiling()
    tile_rows = min(max_tile_rows, _round_up(rows, 8))
    row_tiles = -(-rows // tile_rows)

    # Device-gated 2-way TensorCore split (v7x only).
    num_cores = 2 if (_num_tensorcores() >= 2 and row_tiles >= 2) else 1
    tiles_per_core = -(-row_tiles // num_cores)
    needs_clamp = num_cores * tiles_per_core > row_tiles

    if needs_clamp:
        # Clamp so a core never addresses a fully out-of-bounds block; the
        # (gated) in-kernel mask zeroes any duplicated contribution.
        def in_index_map(c, r):
            return (jnp.minimum(c * tiles_per_core + r, row_tiles - 1), 0)
    else:
        def in_index_map(c, r):
            return (c * tiles_per_core + r, 0)

    kernel = _make_mse_kernel(rows, tile_rows, tiles_per_core)

    out_rows = num_cores * 8
    cost = pl.CostEstimate(
        flops=3 * n_elems,
        transcendentals=0,
        bytes_accessed=(
            x2d.size * x2d.dtype.itemsize
            + y2d.size * y2d.dtype.itemsize
            + out_rows * LANES * 4
        ),
    )

    partials = pl.pallas_call(
        kernel,
        out_shape=jax.ShapeDtypeStruct((out_rows, LANES), jnp.float32),
        grid=(num_cores, tiles_per_core),
        in_specs=[
            pl.BlockSpec((tile_rows, LANES), in_index_map),
            pl.BlockSpec((tile_rows, LANES), in_index_map),
        ],
        out_specs=pl.BlockSpec((8, LANES), lambda c, r: (c, 0)),
        compiler_params=pltpu.CompilerParams(
            dimension_semantics=("parallel", "arbitrary"),
            vmem_limit_bytes=vmem_limit,
        ),
        cost_estimate=cost,
    )(x2d, y2d)

    total = jnp.sum(partials)           # tiny (<= 2048-element) XLA reduce
    if tail_sum is not None:
        total = total + tail_sum
    # Compile-time reciprocal of the true element count (no runtime divide).
    return total * inv_n


if __name__ == "__main__":
    key = jax.random.PRNGKey(0)
    k1, k2, k3, k4 = jax.random.split(key, 4)

    # Small shapes consistent with the module (any matching-shape tensors).
    x = jax.random.normal(k1, (2, 4, 16, 16), dtype=jnp.float32)
    y = jax.random.normal(k2, (2, 4, 16, 16), dtype=jnp.float32)
    loss = mse_loss(x, y)
    jax.block_until_ready(loss)
    ref = jnp.mean((x - y) ** 2)
    assert jnp.allclose(loss, ref, rtol=1e-5, atol=1e-6), (loss, ref)

    # Ragged case: exercises the masked boundary-tile path and the <128-elem
    # lane-tail path (3*5*29 = 435 elements).
    xr = jax.random.normal(k3, (3, 5, 29), dtype=jnp.float32)
    yr = jax.random.normal(k4, (3, 5, 29), dtype=jnp.float32)
    loss_r = mse_loss(xr, yr)
    jax.block_until_ready(loss_r)
    ref_r = jnp.mean((xr - yr) ** 2)
    assert jnp.allclose(loss_r, ref_r, rtol=1e-5, atol=1e-6), (loss_r, ref_r)

    print("KERNEL_OK")
</pallas_src>

<mosaic_0001>
module attributes {stable_mosaic.version = 11 : i64} {
  func.func @kernel(%arg0: i32, %arg1: i32, %arg2: memref<16x128xf32, #tpu.memory_space<vmem>>, %arg3: memref<16x128xf32, #tpu.memory_space<vmem>>, %arg4: memref<8x128xf32, #tpu.memory_space<vmem>>) attributes {dimension_semantics = [#tpu.dimension_semantics<parallel>, #tpu.dimension_semantics<arbitrary>], iteration_bounds = array<i64: 1, 1>, scalar_prefetch = 0 : i64, scratch_operands = 0 : i64, tpu.core_type = #tpu.core_type<tc>, window_params = [{transform_indices = @transform_0, window_bounds = array<i64: 16, 128>}, {transform_indices = @transform_1, window_bounds = array<i64: 16, 128>}, {transform_indices = @transform_2, window_bounds = array<i64: 8, 128>}]} {
    %c0_i32 = arith.constant 0 : i32
    %0 = arith.cmpi eq, %arg1, %c0_i32 : i32
    %1 = arith.extui %0 : i1 to i32
    %c0_i32_0 = arith.constant 0 : i32
    %2 = arith.cmpi ne, %1, %c0_i32_0 : i32
    scf.if %2 {
      %cst = arith.constant 0.000000e+00 : f32
      %17 = vector.broadcast %cst : f32 to vector<8x128xf32>
      %c0_8 = arith.constant 0 : index
      %c0_9 = arith.constant 0 : index
      %18 = vector.load %arg4[%c0_8, %c0_9] : memref<8x128xf32, #tpu.memory_space<vmem>>, vector<8x128xf32>
      tpu.vector_store %arg4[%c0_8, %c0_9], %17 {strides = array<i32>} : memref<8x128xf32, #tpu.memory_space<vmem>>, vector<8x128xf32>,
    } else {
    }
    %c0 = arith.constant 0 : index
    %c0_1 = arith.constant 0 : index
    %3 = vector.load %arg2[%c0, %c0_1] : memref<16x128xf32, #tpu.memory_space<vmem>>, vector<16x128xf32>
    %c0_2 = arith.constant 0 : index
    %c0_3 = arith.constant 0 : index
    %4 = vector.load %arg3[%c0_2, %c0_3] : memref<16x128xf32, #tpu.memory_space<vmem>>, vector<16x128xf32>
    %5 = arith.subf %3, %4 : vector<16x128xf32>
    %6 = arith.mulf %5, %5 : vector<16x128xf32>
    %c1_i32 = arith.constant 1 : i32
    %7 = arith.muli %arg0, %c1_i32 : i32
    %8 = arith.addi %7, %arg1 : i32
    %c16_i32 = arith.constant 16 : i32
    %9 = arith.muli %8, %c16_i32 : i32
    %c16_i32_4 = arith.constant 16 : i32
    %10 = arith.addi %9, %c16_i32_4 : i32
    %c16_i32_5 = arith.constant 16 : i32
    %11 = arith.cmpi sle, %10, %c16_i32_5 : i32
    %12 = arith.extui %11 : i1 to i32
    %c0_i32_6 = arith.constant 0 : i32
    %13 = arith.cmpi ne, %12, %c0_i32_6 : i32
    scf.if %13 {
      %c0_8 = arith.constant 0 : index
      %c0_9 = arith.constant 0 : index
      %17 = vector.load %arg4[%c0_8, %c0_9] : memref<8x128xf32, #tpu.memory_space<vmem>>, vector<8x128xf32>
      %18 = vector.shape_cast %6 : vector<16x128xf32> to vector<2x8x128xf32>
      %cst = arith.constant dense<0.000000e+00> : vector<8x128xf32>
      %19 = vector.multi_reduction <add>, %18, %cst [0] : vector<2x8x128xf32> to vector<8x128xf32>
      %20 = arith.addf %17, %19 : vector<8x128xf32>
      %c0_10 = arith.constant 0 : index
      %c0_11 = arith.constant 0 : index
      %21 = vector.load %arg4[%c0_10, %c0_11] : memref<8x128xf32, #tpu.memory_space<vmem>>, vector<8x128xf32>
      tpu.vector_store %arg4[%c0_10, %c0_11], %20 {strides = array<i32>} : memref<8x128xf32, #tpu.memory_space<vmem>>, vector<8x128xf32>,
    } else {
    }
    %true = arith.constant true
    %14 = arith.xori %11, %true : i1
    %15 = arith.extui %14 : i1 to i32
    %c0_i32_7 = arith.constant 0 : i32
    %16 = arith.cmpi ne, %15, %c0_i32_7 : i32
    scf.if %16 {
      %17 = tpu.iota {dimensions = array<i32: 0>} : vector<16x128xi32>
      %18 = vector.broadcast %9 : i32 to vector<16x128xi32>
      %19 = arith.addi %17, %18 : vector<16x128xi32>
      %c16_i32_8 = arith.constant 16 : i32
      %20 = vector.broadcast %c16_i32_8 : i32 to vector<16x128xi32>
      %21 = arith.cmpi slt, %19, %20 : vector<16x128xi32>
      %cst = arith.constant 0.000000e+00 : f32
      %22 = vector.broadcast %cst : f32 to vector<16x128xf32>
      %23 = arith.select %21, %6, %22 : vector<16x128xi1>, vector<16x128xf32>
      %c0_9 = arith.constant 0 : index
      %c0_10 = arith.constant 0 : index
      %24 = vector.load %arg4[%c0_9, %c0_10] : memref<8x128xf32, #tpu.memory_space<vmem>>, vector<8x128xf32>
      %25 = vector.shape_cast %23 : vector<16x128xf32> to vector<2x8x128xf32>
      %cst_11 = arith.constant dense<0.000000e+00> : vector<8x128xf32>
      %26 = vector.multi_reduction <add>, %25, %cst_11 [0] : vector<2x8x128xf32> to vector<8x128xf32>
      %27 = arith.addf %24, %26 : vector<8x128xf32>
      %c0_12 = arith.constant 0 : index
      %c0_13 = arith.constant 0 : index
      %28 = vector.load %arg4[%c0_12, %c0_13] : memref<8x128xf32, #tpu.memory_space<vmem>>, vector<8x128xf32>
      tpu.vector_store %arg4[%c0_12, %c0_13], %27 {strides = array<i32>} : memref<8x128xf32, #tpu.memory_space<vmem>>, vector<8x128xf32>,
    } else {
    }
    return
  }
  func.func @transform_0(%arg0: i32, %arg1: i32) -> (i32, i32) {
    %c1_i32 = arith.constant 1 : i32
    %0 = arith.muli %arg0, %c1_i32 : i32
    %1 = arith.addi %0, %arg1 : i32
    %c0_i32 = arith.constant 0 : i32
    %c0_i32_0 = arith.constant 0 : i32
    return %1, %c0_i32 : i32, i32
  }
  func.func @transform_1(%arg0: i32, %arg1: i32) -> (i32, i32) {
    %c1_i32 = arith.constant 1 : i32
    %0 = arith.muli %arg0, %c1_i32 : i32
    %1 = arith.addi %0, %arg1 : i32
    %c0_i32 = arith.constant 0 : i32
    %c0_i32_0 = arith.constant 0 : i32
    return %1, %c0_i32 : i32, i32
  }
  func.func @transform_2(%arg0: i32, %arg1: i32) -> (i32, i32) {
    %c0_i32 = arith.constant 0 : i32
    %c0_i32_0 = arith.constant 0 : i32
    return %arg0, %c0_i32 : i32, i32
  }
}

</mosaic_0001>

<bundles_post_ra>
// kernel: tpu_custom_call.1
= control target key start
LH: loop header
LB: loop body
LE: loop exit
PB: predicated region body
PF: predicated region fallthrough
CT: control target
= control target key end

     0   :  { %7 = vsyncpa [#allocation3], 0  ;;  %s244_s0 = inlined_call_operand.hbm [shape: f32[16,128], index: 0, kind: input, shape index: {}]   ;;  %s245_s1 = inlined_call_operand.hbm [shape: f32[16,128], index: 1, kind: input, shape index: {}]   ;;  %s246_s2 = inlined_call_operand.hbm [shape: f32[8,128], index: 2, kind: output, shape index: {}]  }
   0x1   :  { %8 = vsyncpa [#allocation6], 0 }
   0x2   :  { %9 = vsyncpa [#allocation4], 0  ;;  %s188_s9 = smov [#allocation2]   ;;  %s116_s13 = scalar_lea.hbm %s244_s0, 256 }
   0x3   :  { %s19_s10 = sshll.u32 %s188_s9, 4  ;;  %p117_p0 = scmp.ne.s32.totalorder %s244_s0, %s116_s13  ;;  %s20_s10 = int_to_ptr.vmem [resolvable:$true] %s19_s10 }
   0x4   :  { %p120_p1 = scmp.lt.u32.totalorder %s116_s13, %s244_s0 }
   0x6   :  { %p122_p2 = pnand %p120_p1, %p117_p0 }
   0x8   :  { %125 = shalt.err (!%p122_p2)
}
   0x9   :  { %s126_s18 = scalar_lea.vmem %s20_s10, 256  ;;  %p131_p4 = scmp.lt.s32.totalorder %s20_s10, %s20_s10 }
   0xa   :  { %p127_p3 = scmp.ne.s32.totalorder %s20_s10, %s126_s18  ;;  %p132_p5 = scmp.lt.s32.totalorder %s126_s18, %s126_s18 }
   0xc   :  { %p133_p6 = por %p132_p5, %p131_p4 }
   0xe   :  { %p134_p7 = pnand %p133_p6, %p127_p3 }
  0x10   :  { %137 = shalt.err (!%p134_p7)
}
  0x11   :  { %s189_s19 = smov 128   ;;  %s190_s20 = smov 8  }
  0x12   :  { %25 = dma.hbm_to_vmem [thread:$0]  %s244_s0, 256, %s20_s10, [#allocation3], %s189_s19, %s189_s19, %s190_s20  }
  0x13   :  { %s191_s23 = smov [#allocation5]   ;;  %s138_s27 = scalar_lea.hbm %s245_s1, 256 }
  0x14   :  { %s35_s24 = sshll.u32 %s191_s23, 4  ;;  %p139_p8 = scmp.ne.s32.totalorder %s245_s1, %s138_s27  ;;  %s36_s24 = int_to_ptr.vmem [resolvable:$true] %s35_s24 }
  0x15   :  { %p142_p9 = scmp.lt.u32.totalorder %s138_s27, %s245_s1 }
  0x17   :  { %p144_p10 = pnand %p142_p9, %p139_p8 }
  0x19   :  { %147 = shalt.err (!%p144_p10)
}
  0x1a   :  { %s148_s4 = scalar_lea.vmem %s36_s24, 256  ;;  %p153_p12 = scmp.lt.s32.totalorder %s36_s24, %s36_s24 }
  0x1b   :  { %p149_p11 = scmp.ne.s32.totalorder %s36_s24, %s148_s4  ;;  %p154_p13 = scmp.lt.s32.totalorder %s148_s4, %s148_s4 }
  0x1d   :  { %p155_p0 = por %p154_p13, %p153_p12 }
  0x1f   :  { %p156_p1 = pnand %p155_p0, %p149_p11 }
  0x21   :  { %159 = shalt.err (!%p156_p1)
}
  0x22   :  { %41 = dma.hbm_to_vmem [thread:$0]  %s245_s1, 256, %s36_s24, [#allocation6], %s189_s19, %s189_s19, %s190_s20  }
  0x23   :  { %182 = dma.done.wait [#allocation3], 256  }
  0x24   :  { %183 = vsyncadd [#allocation3], 4294967040 }
  0x25   :  { %184 = dma.done.wait [#allocation6], 256  }
  0x26   :  { %185 = vsyncadd [#allocation6], 4294967040  ;;  %v57_v0 = vld [vmem:[#allocation2] sm:$0xff]  ;;  %v58_v1 = vld [vmem:[#allocation2 + $0x8] sm:$0xff]  ;;  %s192_s6 = smov [#allocation7]  }
  0x27   :  { %v59_v2 = vld [vmem:[#allocation5] sm:$0xff]  ;;  %v60_v3 = vld [vmem:[#allocation5 + $0x8] sm:$0xff]  ;;  %s100_s7 = sshll.u32 %s192_s6, 4  ;;  %s101_s7 = int_to_ptr.vmem [resolvable:$true] %s100_s7 }
  0x28   :  { %v61_v4 = vsub.f32 %v57_v0, %v59_v2  ;;  %v62_v5 = vsub.f32 %v58_v1, %v60_v3  ;;  %s160_s8 = scalar_lea.vmem %s101_s7, 128  ;;  %p165_p3 = scmp.lt.s32.totalorder %s101_s7, %s101_s7 }
  0x29   :  { %p161_p2 = scmp.ne.s32.totalorder %s101_s7, %s160_s8  ;;  %p166_p4 = scmp.lt.s32.totalorder %s160_s8, %s160_s8 }
  0x2a   :  { %v63_v6 = vmul.f32 %v61_v4, %v61_v4  ;;  %v64_v7 = vmul.f32 %v62_v5, %v62_v5 }
  0x2b   :  { %p167_p5 = por %p166_p4, %p165_p3 }
  0x2c   :  { %v73_v8 = vadd.f32 %v64_v7, %v63_v6 }
  0x2d   :  { %p168_p6 = pnand %p167_p5, %p161_p2 }
  0x2e   :  { %75 = vst [vmem:[#allocation7] sm:$0xff] %v73_v8 }
  0x2f   :  { %171 = shalt.err (!%p168_p6)
}
  0x30   :  { %s172_s10 = scalar_lea.hbm %s246_s2, 128 }
  0x31   :  { %p173_p7 = scmp.ne.s32.totalorder %s246_s2, %s172_s10  ;;  %p176_p8 = scmp.lt.u32.totalorder %s172_s10, %s246_s2 }
  0x33   :  { %p178_p9 = pnand %p176_p8, %p173_p7 }
  0x35   :  { %181 = shalt.err (!%p178_p9)
}
  0x36   :  { %103 = dma.vmem_to_hbm [thread:$0]  %s101_s7, 128, %s246_s2, [#allocation4]  }
  0x37   :  { %186 = dma.done.wait [#allocation4], 128  }
  0x38   :  { %187 = vsyncadd [#allocation4], 4294967168 }
  0x39   :  { %107 = vsyncpa [#allocation3], 1 }
  0x3a   :  { %108 = vsyncpa [#allocation6], 1 }
  0x3b   :  { %109 = vsyncpa [#allocation4], 1 }

</bundles_post_ra>
